<compile_context>
chip_gen: v7x
topology: tpu7x:2x2x1
jax: 0.10.0
libtpu: 0.0.40
codegen_flags: <defaults>
</compile_context>

<pallas_src>
import functools

import jax
import jax.numpy as jnp
from jax.experimental import pallas as pl
from jax.experimental.pallas import tpu as pltpu

DROPOUT_P = 0.1
DROP_SCALE = 1.0 / (1.0 - DROPOUT_P)
DROP_THRESH = int(round(DROPOUT_P * 2 ** 32))   # keep element iff bits >= thresh
LANE = 128        # pad O and H (lane axis) to multiples of this
SUBLANE = 8       # pad batch (sublane axis) to multiples of this
NEG_BIG = -1e30   # mask value for padded output lanes before log_softmax


def _round_up(x, m):
    return ((x + m - 1) // m) * m


# ----------------------------------------------------------------------------
# Kernel
# ----------------------------------------------------------------------------
def _rnn_seq_kernel(cat_ref, x_ref, h0_ref, bits_ref,
                    wc_ref, wx_ref, wh_ref, b_ih_ref,
                    wo_o_ref, wo_h_ref, b_o2o_ref,
                    out_ref, hid_out_ref,
                    h_scratch,
                    *, o_pad, o_real):
    t = pl.program_id(1)

    # First timestep of this batch tile: load the initial hidden state.
    @pl.when(t == 0)
    def _():
        h_scratch[...] = h0_ref[...]

    w_dtype = wc_ref.dtype
    h_f32 = h_scratch[...]                      # (BT, H_pad) f32 carry
    h = h_f32.astype(w_dtype)                   # bf16 for the MXU
    cat = cat_ref[...]                          # (BT, C)  bf16
    x = x_ref[0]                                # (BT, I)  bf16

    # Fused (i2o | i2h): concat replaced by split matmuls, f32 accumulation.
    fused = (jnp.dot(cat, wc_ref[...], preferred_element_type=jnp.float32)
             + jnp.dot(x, wx_ref[...], preferred_element_type=jnp.float32)
             + jnp.dot(h, wh_ref[...], preferred_element_type=jnp.float32)
             + b_ih_ref[...])                   # (BT, O_pad + H_pad)
    out1 = fused[:, :o_pad]                     # (BT, O_pad)  f32
    hid_new = fused[:, o_pad:]                  # (BT, H_pad)  f32
    h_scratch[...] = hid_new                    # carry for next timestep
    hid_out_ref[...] = hid_new                  # resident; flushed once / tile

    # o2o on (out1 | old hidden), again as split matmuls.
    out2 = (jnp.dot(out1.astype(w_dtype), wo_o_ref[...],
                    preferred_element_type=jnp.float32)
            + jnp.dot(h, wo_h_ref[...], preferred_element_type=jnp.float32)
            + b_o2o_ref[...])                   # (BT, O_pad) f32

    # dropout(p=0.1, training=True): integer-space keep test on streamed bits.
    keep = bits_ref[0] >= jnp.uint32(DROP_THRESH)
    dropped = jnp.where(keep, out2 * DROP_SCALE, 0.0)

    # Mask padded lanes so log_softmax normalizes over the real output width.
    lane = jax.lax.broadcasted_iota(jnp.int32, dropped.shape, 1)
    masked = jnp.where(lane < o_real, dropped, NEG_BIG)

    # log_softmax along dim=1 (f32 epilogue).
    m = jnp.max(masked, axis=1, keepdims=True)
    z = masked - m
    lse = jnp.log(jnp.sum(jnp.exp(z), axis=1, keepdims=True))
    out_ref[0] = (z - lse).astype(out_ref.dtype)


# ----------------------------------------------------------------------------
# Wrapper
# ----------------------------------------------------------------------------
@functools.partial(jax.jit, static_argnames=("o_real",))
def rnn_forward(category, inputs, hidden, dropout_bits, kparams, o_real):
    """Runs the full T-step recurrence in one Pallas call.

    category:     (B, C) f32         inputs: (T, B, I) f32
    hidden:       (B, H) f32         dropout_bits: (T, B, O) uint32
    kparams:      packed / padded / bf16 weights from pack_params()
    Returns (log_probs (T, B, O), final_hidden (B, H)).
    """
    T, B, I = inputs.shape
    C = category.shape[1]
    H = hidden.shape[1]
    O_pad = kparams["b_o2o"].shape[1]
    H_pad = kparams["wh"].shape[0]
    BT = SUBLANE
    B_pad = _round_up(max(B, BT), BT)
    n_bt = B_pad // BT
    w_dtype = kparams["wc"].dtype

    # Pad activations to lane/sublane-dense tiles (sliced off at the end).
    cat_p = jnp.pad(category, ((0, B_pad - B), (0, 0))).astype(w_dtype)
    x_p = jnp.pad(inputs, ((0, 0), (0, B_pad - B), (0, 0))).astype(w_dtype)
    h0_p = jnp.pad(hidden, ((0, B_pad - B), (0, H_pad - H))).astype(jnp.float32)
    bits_p = jnp.pad(dropout_bits,
                     ((0, 0), (0, B_pad - B), (0, O_pad - o_real)))

    resident = lambda b, t: (0, 0)      # weights / biases: stay in VMEM
    per_b = lambda b, t: (b, 0)         # per batch tile, constant over time
    per_bt = lambda b, t: (t, b, 0)     # streamed per timestep

    kernel = functools.partial(_rnn_seq_kernel, o_pad=O_pad, o_real=o_real)

    log_pad, hid_pad = pl.pallas_call(
        kernel,
        grid=(n_bt, T),
        in_specs=[
            pl.BlockSpec((BT, C), per_b),                     # category
            pl.BlockSpec((1, BT, I), per_bt),                 # inputs x_t
            pl.BlockSpec((BT, H_pad), per_b),                 # initial hidden
            pl.BlockSpec((1, BT, O_pad), per_bt),             # dropout bits
            pl.BlockSpec((C, O_pad + H_pad), resident),       # Wc  (i2o|i2h)
            pl.BlockSpec((I, O_pad + H_pad), resident),       # Wx  (i2o|i2h)
            pl.BlockSpec((H_pad, O_pad + H_pad), resident),   # Wh  (i2o|i2h)
            pl.BlockSpec((1, O_pad + H_pad), resident),       # b   (i2o|i2h)
            pl.BlockSpec((O_pad, O_pad), resident),           # Wo2o (out1 part)
            pl.BlockSpec((H_pad, O_pad), resident),           # Wo2o (hid part)
            pl.BlockSpec((1, O_pad), resident),               # b_o2o
        ],
        out_specs=(
            pl.BlockSpec((1, BT, O_pad), per_bt),             # log_probs
            pl.BlockSpec((BT, H_pad), per_b),                 # final hidden
        ),
        out_shape=(
            jax.ShapeDtypeStruct((T, B_pad, O_pad), jnp.float32),
            jax.ShapeDtypeStruct((B_pad, H_pad), jnp.float32),
        ),
        scratch_shapes=[pltpu.VMEM((BT, H_pad), jnp.float32)],
        compiler_params=pltpu.CompilerParams(
            dimension_semantics=("parallel", "arbitrary")),
    )(cat_p, x_p, h0_p, bits_p,
      kparams["wc"], kparams["wx"], kparams["wh"], kparams["b_ih"],
      kparams["wo_o"], kparams["wo_h"], kparams["b_o2o"])

    return log_pad[:, :B, :o_real], hid_pad[:B, :H]


# ----------------------------------------------------------------------------
# Parameters (torch-style init) and kernel-layout packing
# ----------------------------------------------------------------------------
def init_params(key, category_size, input_size, hidden_size, output_size):
    """nn.Linear-style init, torch layout: W (out, in), b (out,)."""
    def linear(k, fan_in, fan_out):
        kw, kb = jax.random.split(k)
        bound = 1.0 / (fan_in ** 0.5)
        w = jax.random.uniform(kw, (fan_out, fan_in), jnp.float32, -bound, bound)
        b = jax.random.uniform(kb, (fan_out,), jnp.float32, -bound, bound)
        return w, b

    comb = category_size + input_size + hidden_size
    k1, k2, k3 = jax.random.split(key, 3)
    i2o_w, i2o_b = linear(k1, comb, output_size)
    i2h_w, i2h_b = linear(k2, comb, hidden_size)
    o2o_w, o2o_b = linear(k3, output_size + hidden_size, output_size)
    return dict(i2o_w=i2o_w, i2o_b=i2o_b, i2h_w=i2h_w, i2h_b=i2h_b,
                o2o_w=o2o_w, o2o_b=o2o_b)


def pack_params(p, C, I, H, O, w_dtype=jnp.bfloat16):
    """Split / fuse / pad / transpose the torch-layout params for the kernel.

    i2o and i2h are fused along out_features (padded to 128 lanes each), the
    input axis is split into (category | input | hidden) groups, and weights
    are transposed to (in, out) and cast to bf16.  Biases stay f32.
    """
    O_pad = _round_up(O, LANE)
    H_pad = _round_up(H, LANE)

    def pad_rows(w, rows):
        return jnp.pad(w, ((0, rows - w.shape[0]), (0, 0)))

    # fused (i2o | i2h), torch layout (out, in), per-group out padding
    w_fused = jnp.concatenate(
        [pad_rows(p["i2o_w"], O_pad), pad_rows(p["i2h_w"], H_pad)], axis=0)
    b_fused = jnp.concatenate(
        [jnp.pad(p["i2o_b"], (0, O_pad - O)),
         jnp.pad(p["i2h_b"], (0, H_pad - H))])

    wc = w_fused[:, :C].T                                        # (C, O_pad+H_pad)
    wx = w_fused[:, C:C + I].T                                   # (I, O_pad+H_pad)
    wh = jnp.pad(w_fused[:, C + I:].T, ((0, H_pad - H), (0, 0)))  # (H_pad, ...)

    # o2o: split in-axis into (out1 | hidden) groups
    w_o2o = pad_rows(p["o2o_w"], O_pad)                          # (O_pad, O+H)
    wo_o = jnp.pad(w_o2o[:, :O].T, ((0, O_pad - O), (0, 0)))     # (O_pad, O_pad)
    wo_h = jnp.pad(w_o2o[:, O:].T, ((0, H_pad - H), (0, 0)))     # (H_pad, O_pad)
    b_o2o = jnp.pad(p["o2o_b"], (0, O_pad - O))

    return dict(
        wc=wc.astype(w_dtype), wx=wx.astype(w_dtype), wh=wh.astype(w_dtype),
        b_ih=b_fused[None, :].astype(jnp.float32),
        wo_o=wo_o.astype(w_dtype), wo_h=wo_h.astype(w_dtype),
        b_o2o=b_o2o[None, :].astype(jnp.float32),
    )


# ----------------------------------------------------------------------------
# Pure-JAX reference (mirrors the PyTorch module, same bf16 matmul dtypes)
# ----------------------------------------------------------------------------
def rnn_reference(category, inputs, hidden, dropout_bits, params,
                  w_dtype=jnp.bfloat16):
    def bdot(a, b):
        return jnp.dot(a.astype(w_dtype), b.astype(w_dtype),
                       preferred_element_type=jnp.float32)

    thresh = jnp.uint32(DROP_THRESH)
    outs = []
    h = hidden
    for t in range(inputs.shape[0]):
        combined = jnp.concatenate([category, inputs[t], h], axis=1)
        out1 = bdot(combined, params["i2o_w"].T) + params["i2o_b"]
        h_new = bdot(combined, params["i2h_w"].T) + params["i2h_b"]
        out2 = bdot(jnp.concatenate([out1, h], axis=1),
                    params["o2o_w"].T) + params["o2o_b"]
        keep = dropout_bits[t] >= thresh
        dropped = jnp.where(keep, out2 * DROP_SCALE, 0.0)
        outs.append(jax.nn.log_softmax(dropped, axis=1))
        h = h_new
    return jnp.stack(outs, axis=0), h


# ----------------------------------------------------------------------------
if __name__ == "__main__":
    B, C, I, H, O, T = 2, 4, 8, 32, 16, 8

    key = jax.random.PRNGKey(0)
    kp, kc, ki, kb = jax.random.split(key, 4)

    params = init_params(kp, C, I, H, O)
    kparams = pack_params(params, C, I, H, O)

    category = jax.random.normal(kc, (B, C), jnp.float32)
    inputs = jax.random.normal(ki, (T, B, I), jnp.float32)
    hidden = jnp.zeros((B, H), jnp.float32)                  # RNN.initHidden()
    dropout_bits = jax.random.bits(kb, (T, B, O), dtype=jnp.uint32)

    log_probs, new_hidden = rnn_forward(category, inputs, hidden,
                                        dropout_bits, kparams, o_real=O)
    jax.block_until_ready((log_probs, new_hidden))

    ref_log, ref_hid = rnn_reference(category, inputs, hidden,
                                     dropout_bits, params)

    assert log_probs.shape == (T, B, O)
    assert new_hidden.shape == (B, H)
    assert bool(jnp.all(jnp.isfinite(log_probs)))
    # log_softmax rows must sum to 1 in probability space.
    assert bool(jnp.allclose(jnp.sum(jnp.exp(log_probs), axis=-1), 1.0,
                             atol=1e-3))
    # Match the step-by-step PyTorch-equivalent reference.
    assert bool(jnp.allclose(log_probs, ref_log, atol=2e-2, rtol=2e-2))
    assert bool(jnp.allclose(new_hidden, ref_hid, atol=2e-2, rtol=2e-2))

    print("KERNEL_OK")
</pallas_src>

<mosaic_0001>
module attributes {stable_mosaic.version = 11 : i64} {
  func.func @_rnn_seq_kernel(%arg0: i32, %arg1: i32, %arg2: memref<8x4xbf16, #tpu.memory_space<vmem>>, %arg3: memref<1x8x8xbf16, #tpu.memory_space<vmem>>, %arg4: memref<8x128xf32, #tpu.memory_space<vmem>>, %arg5: memref<1x8x128xi32, #tpu.memory_space<vmem>>, %arg6: memref<4x256xbf16, #tpu.memory_space<vmem>>, %arg7: memref<8x256xbf16, #tpu.memory_space<vmem>>, %arg8: memref<128x256xbf16, #tpu.memory_space<vmem>>, %arg9: memref<1x256xf32, #tpu.memory_space<vmem>>, %arg10: memref<128x128xbf16, #tpu.memory_space<vmem>>, %arg11: memref<128x128xbf16, #tpu.memory_space<vmem>>, %arg12: memref<1x128xf32, #tpu.memory_space<vmem>>, %arg13: memref<1x8x128xf32, #tpu.memory_space<vmem>>, %arg14: memref<8x128xf32, #tpu.memory_space<vmem>>, %arg15: memref<8x128xf32, #tpu.memory_space<vmem>>) attributes {dimension_semantics = [#tpu.dimension_semantics<parallel>, #tpu.dimension_semantics<arbitrary>], iteration_bounds = array<i64: 1, 8>, scalar_prefetch = 0 : i64, scratch_operands = 1 : i64, tpu.core_type = #tpu.core_type<tc>, window_params = [{transform_indices = @transform_0, window_bounds = array<i64: 8, 4>}, {transform_indices = @transform_1, window_bounds = array<i64: 1, 8, 8>}, {transform_indices = @transform_2, window_bounds = array<i64: 8, 128>}, {transform_indices = @transform_3, window_bounds = array<i64: 1, 8, 128>}, {pipeline_mode = #tpu.pipeline_mode<synchronous>, transform_indices = @transform_4, window_bounds = array<i64: 4, 256>}, {pipeline_mode = #tpu.pipeline_mode<synchronous>, transform_indices = @transform_5, window_bounds = array<i64: 8, 256>}, {pipeline_mode = #tpu.pipeline_mode<synchronous>, transform_indices = @transform_6, window_bounds = array<i64: 128, 256>}, {pipeline_mode = #tpu.pipeline_mode<synchronous>, transform_indices = @transform_7, window_bounds = array<i64: 1, 256>}, {pipeline_mode = #tpu.pipeline_mode<synchronous>, transform_indices = @transform_8, window_bounds = array<i64: 128, 128>}, {pipeline_mode = #tpu.pipeline_mode<synchronous>, transform_indices = @transform_9, window_bounds = array<i64: 128, 128>}, {pipeline_mode = #tpu.pipeline_mode<synchronous>, transform_indices = @transform_10, window_bounds = array<i64: 1, 128>}, {transform_indices = @transform_11, window_bounds = array<i64: 1, 8, 128>}, {transform_indices = @transform_12, window_bounds = array<i64: 8, 128>}]} {
    %c0_i32 = arith.constant 0 : i32
    %0 = arith.cmpi eq, %arg1, %c0_i32 : i32
    %1 = arith.extui %0 : i1 to i32
    %c0_i32_0 = arith.constant 0 : i32
    %2 = arith.cmpi ne, %1, %c0_i32_0 : i32
    scf.if %2 {
      %c0_40 = arith.constant 0 : index
      %c0_41 = arith.constant 0 : index
      %58 = vector.load %arg4[%c0_40, %c0_41] : memref<8x128xf32, #tpu.memory_space<vmem>>, vector<8x128xf32>
      %c0_42 = arith.constant 0 : index
      %c0_43 = arith.constant 0 : index
      %59 = vector.load %arg15[%c0_42, %c0_43] : memref<8x128xf32, #tpu.memory_space<vmem>>, vector<8x128xf32>
      tpu.vector_store %arg15[%c0_42, %c0_43], %58 {strides = array<i32>} : memref<8x128xf32, #tpu.memory_space<vmem>>, vector<8x128xf32>,
    } else {
    }
    %c0 = arith.constant 0 : index
    %c0_1 = arith.constant 0 : index
    %3 = vector.load %arg15[%c0, %c0_1] : memref<8x128xf32, #tpu.memory_space<vmem>>, vector<8x128xf32>
    %4 = arith.truncf %3 : vector<8x128xf32> to vector<8x128xbf16>
    %c0_2 = arith.constant 0 : index
    %c0_3 = arith.constant 0 : index
    %5 = vector.load %arg2[%c0_2, %c0_3] : memref<8x4xbf16, #tpu.memory_space<vmem>>, vector<8x4xbf16>
    %c0_4 = arith.constant 0 : index
    %c0_5 = arith.constant 0 : index
    %c0_6 = arith.constant 0 : index
    %6 = vector.load %arg3[%c0_4, %c0_5, %c0_6] : memref<1x8x8xbf16, #tpu.memory_space<vmem>>, vector<1x8x8xbf16>
    %7 = vector.shape_cast %6 : vector<1x8x8xbf16> to vector<8x8xbf16>
    %c0_7 = arith.constant 0 : index
    %c0_8 = arith.constant 0 : index
    %8 = vector.load %arg6[%c0_7, %c0_8] : memref<4x256xbf16, #tpu.memory_space<vmem>>, vector<4x256xbf16>
    %cst = arith.constant dense<0.000000e+00> : vector<8x256xf32>
    %9 = tpu.matmul %5, %8, %cst {dimension_numbers = #tpu.dot_dimension_numbers<[1], [0], [0], [1], [0, 0, 1, 1], [], []>} : vector<8x4xbf16>, vector<4x256xbf16>, vector<8x256xf32> -> vector<8x256xf32>
    %c0_9 = arith.constant 0 : index
    %c0_10 = arith.constant 0 : index
    %10 = vector.load %arg7[%c0_9, %c0_10] : memref<8x256xbf16, #tpu.memory_space<vmem>>, vector<8x256xbf16>
    %cst_11 = arith.constant dense<0.000000e+00> : vector<8x256xf32>
    %11 = tpu.matmul %7, %10, %cst_11 {dimension_numbers = #tpu.dot_dimension_numbers<[1], [0], [0], [1], [0, 0, 1, 1], [], []>} : vector<8x8xbf16>, vector<8x256xbf16>, vector<8x256xf32> -> vector<8x256xf32>
    %12 = arith.addf %9, %11 : vector<8x256xf32>
    %c0_12 = arith.constant 0 : index
    %c0_13 = arith.constant 0 : index
    %13 = vector.load %arg8[%c0_12, %c0_13] : memref<128x256xbf16, #tpu.memory_space<vmem>>, vector<128x256xbf16>
    %cst_14 = arith.constant dense<0.000000e+00> : vector<8x256xf32>
    %14 = tpu.matmul %4, %13, %cst_14 {dimension_numbers = #tpu.dot_dimension_numbers<[1], [0], [0], [1], [0, 0, 1, 1], [], []>} : vector<8x128xbf16>, vector<128x256xbf16>, vector<8x256xf32> -> vector<8x256xf32>
    %15 = arith.addf %12, %14 : vector<8x256xf32>
    %c0_15 = arith.constant 0 : index
    %c0_16 = arith.constant 0 : index
    %16 = vector.load %arg9[%c0_15, %c0_16] : memref<1x256xf32, #tpu.memory_space<vmem>>, vector<1x256xf32>
    %17 = vector.broadcast %16 : vector<1x256xf32> to vector<8x256xf32>
    %18 = arith.addf %15, %17 : vector<8x256xf32>
    %19 = vector.extract_strided_slice %18 {offsets = [0, 0], sizes = [8, 128], strides = [1, 1]} : vector<8x256xf32> to vector<8x128xf32>
    %20 = vector.extract_strided_slice %18 {offsets = [0, 128], sizes = [8, 128], strides = [1, 1]} : vector<8x256xf32> to vector<8x128xf32>
    %c0_17 = arith.constant 0 : index
    %c0_18 = arith.constant 0 : index
    %21 = vector.load %arg15[%c0_17, %c0_18] : memref<8x128xf32, #tpu.memory_space<vmem>>, vector<8x128xf32>
    tpu.vector_store %arg15[%c0_17, %c0_18], %20 {strides = array<i32>} : memref<8x128xf32, #tpu.memory_space<vmem>>, vector<8x128xf32>,
    %c0_19 = arith.constant 0 : index
    %c0_20 = arith.constant 0 : index
    %22 = vector.load %arg14[%c0_19, %c0_20] : memref<8x128xf32, #tpu.memory_space<vmem>>, vector<8x128xf32>
    tpu.vector_store %arg14[%c0_19, %c0_20], %20 {strides = array<i32>} : memref<8x128xf32, #tpu.memory_space<vmem>>, vector<8x128xf32>,
    %23 = arith.truncf %19 : vector<8x128xf32> to vector<8x128xbf16>
    %c0_21 = arith.constant 0 : index
    %c0_22 = arith.constant 0 : index
    %24 = vector.load %arg10[%c0_21, %c0_22] : memref<128x128xbf16, #tpu.memory_space<vmem>>, vector<128x128xbf16>
    %cst_23 = arith.constant dense<0.000000e+00> : vector<8x128xf32>
    %25 = tpu.matmul %23, %24, %cst_23 {dimension_numbers = #tpu.dot_dimension_numbers<[1], [0], [0], [1], [0, 0, 1, 1], [], []>} : vector<8x128xbf16>, vector<128x128xbf16>, vector<8x128xf32> -> vector<8x128xf32>
    %c0_24 = arith.constant 0 : index
    %c0_25 = arith.constant 0 : index
    %26 = vector.load %arg11[%c0_24, %c0_25] : memref<128x128xbf16, #tpu.memory_space<vmem>>, vector<128x128xbf16>
    %cst_26 = arith.constant dense<0.000000e+00> : vector<8x128xf32>
    %27 = tpu.matmul %4, %26, %cst_26 {dimension_numbers = #tpu.dot_dimension_numbers<[1], [0], [0], [1], [0, 0, 1, 1], [], []>} : vector<8x128xbf16>, vector<128x128xbf16>, vector<8x128xf32> -> vector<8x128xf32>
    %28 = arith.addf %25, %27 : vector<8x128xf32>
    %c0_27 = arith.constant 0 : index
    %c0_28 = arith.constant 0 : index
    %29 = vector.load %arg12[%c0_27, %c0_28] : memref<1x128xf32, #tpu.memory_space<vmem>>, vector<1x128xf32>
    %30 = vector.broadcast %29 : vector<1x128xf32> to vector<8x128xf32>
    %31 = arith.addf %28, %30 : vector<8x128xf32>
    %c0_29 = arith.constant 0 : index
    %c0_30 = arith.constant 0 : index
    %c0_31 = arith.constant 0 : index
    %32 = vector.load %arg5[%c0_29, %c0_30, %c0_31] : memref<1x8x128xi32, #tpu.memory_space<vmem>>, vector<1x8x128xi32>
    %33 = vector.shape_cast %32 : vector<1x8x128xi32> to vector<8x128xi32>
    %c429496730_i32 = arith.constant 429496730 : i32
    %34 = vector.broadcast %c429496730_i32 : i32 to vector<8x128xi32>
    %35 = arith.cmpi uge, %33, %34 : vector<8x128xi32>
    %cst_32 = arith.constant 1.11111116 : f32
    %36 = vector.broadcast %cst_32 : f32 to vector<8x128xf32>
    %37 = arith.mulf %31, %36 : vector<8x128xf32>
    %cst_33 = arith.constant 0.000000e+00 : f32
    %38 = vector.broadcast %cst_33 : f32 to vector<8x128xf32>
    %39 = arith.select %35, %37, %38 : vector<8x128xi1>, vector<8x128xf32>
    %40 = tpu.iota {dimensions = array<i32: 1>} : vector<8x128xi32>
    %c16_i32 = arith.constant 16 : i32
    %41 = vector.broadcast %c16_i32 : i32 to vector<8x128xi32>
    %42 = arith.cmpi slt, %40, %41 : vector<8x128xi32>
    %cst_34 = arith.constant -1.000000e+30 : f32
    %43 = vector.broadcast %cst_34 : f32 to vector<8x128xf32>
    %44 = arith.select %42, %39, %43 : vector<8x128xi1>, vector<8x128xf32>
    %cst_35 = arith.constant dense<0xFF800000> : vector<8xf32>
    %45 = vector.multi_reduction <maximumf>, %44, %cst_35 [1] : vector<8x128xf32> to vector<8xf32>
    %46 = vector.shape_cast %45 : vector<8xf32> to vector<8x1xf32>
    %47 = vector.broadcast %46 : vector<8x1xf32> to vector<8x128xf32>
    %48 = arith.subf %44, %47 : vector<8x128xf32>
    %49 = math.exp %48 : vector<8x128xf32>
    %cst_36 = arith.constant dense<0.000000e+00> : vector<8xf32>
    %50 = vector.multi_reduction <add>, %49, %cst_36 [1] : vector<8x128xf32> to vector<8xf32>
    %51 = vector.shape_cast %50 : vector<8xf32> to vector<8x1xf32>
    %52 = math.log %51 : vector<8x1xf32>
    %53 = vector.broadcast %52 : vector<8x1xf32> to vector<8x128xf32>
    %54 = arith.subf %48, %53 : vector<8x128xf32>
    %c0_37 = arith.constant 0 : index
    %c0_38 = arith.constant 0 : index
    %c0_39 = arith.constant 0 : index
    %55 = vector.load %arg13[%c0_37, %c0_38, %c0_39] : memref<1x8x128xf32, #tpu.memory_space<vmem>>, vector<1x8x128xf32>
    %56 = vector.shape_cast %55 : vector<1x8x128xf32> to vector<8x128xf32>
    %57 = vector.shape_cast %54 : vector<8x128xf32> to vector<1x8x128xf32>
    tpu.vector_store %arg13[%c0_37, %c0_38, %c0_39], %57 {strides = array<i32>} : memref<1x8x128xf32, #tpu.memory_space<vmem>>, vector<1x8x128xf32>,
    return
  }
  func.func @transform_0(%arg0: i32, %arg1: i32) -> (i32, i32) {
    %c0_i32 = arith.constant 0 : i32
    %c0_i32_0 = arith.constant 0 : i32
    return %arg0, %c0_i32 : i32, i32
  }
  func.func @transform_1(%arg0: i32, %arg1: i32) -> (i32, i32, i32) {
    %c0_i32 = arith.constant 0 : i32
    %c0_i32_0 = arith.constant 0 : i32
    return %arg1, %arg0, %c0_i32 : i32, i32, i32
  }
  func.func @transform_2(%arg0: i32, %arg1: i32) -> (i32, i32) {
    %c0_i32 = arith.constant 0 : i32
    %c0_i32_0 = arith.constant 0 : i32
    return %arg0, %c0_i32 : i32, i32
  }
  func.func @transform_3(%arg0: i32, %arg1: i32) -> (i32, i32, i32) {
    %c0_i32 = arith.constant 0 : i32
    %c0_i32_0 = arith.constant 0 : i32
    return %arg1, %arg0, %c0_i32 : i32, i32, i32
  }
  func.func @transform_4(%arg0: i32, %arg1: i32) -> (i32, i32) {
    %c0_i32 = arith.constant 0 : i32
    %c0_i32_0 = arith.constant 0 : i32
    %c0_i32_1 = arith.constant 0 : i32
    return %c0_i32, %c0_i32_0 : i32, i32
  }
  func.func @transform_5(%arg0: i32, %arg1: i32) -> (i32, i32) {
    %c0_i32 = arith.constant 0 : i32
    %c0_i32_0 = arith.constant 0 : i32
    %c0_i32_1 = arith.constant 0 : i32
    return %c0_i32, %c0_i32_0 : i32, i32
  }
  func.func @transform_6(%arg0: i32, %arg1: i32) -> (i32, i32) {
    %c0_i32 = arith.constant 0 : i32
    %c0_i32_0 = arith.constant 0 : i32
    %c0_i32_1 = arith.constant 0 : i32
    return %c0_i32, %c0_i32_0 : i32, i32
  }
  func.func @transform_7(%arg0: i32, %arg1: i32) -> (i32, i32) {
    %c0_i32 = arith.constant 0 : i32
    %c0_i32_0 = arith.constant 0 : i32
    %c0_i32_1 = arith.constant 0 : i32
    return %c0_i32, %c0_i32_0 : i32, i32
  }
  func.func @transform_8(%arg0: i32, %arg1: i32) -> (i32, i32) {
    %c0_i32 = arith.constant 0 : i32
    %c0_i32_0 = arith.constant 0 : i32
    %c0_i32_1 = arith.constant 0 : i32
    return %c0_i32, %c0_i32_0 : i32, i32
  }
  func.func @transform_9(%arg0: i32, %arg1: i32) -> (i32, i32) {
    %c0_i32 = arith.constant 0 : i32
    %c0_i32_0 = arith.constant 0 : i32
    %c0_i32_1 = arith.constant 0 : i32
    return %c0_i32, %c0_i32_0 : i32, i32
  }
  func.func @transform_10(%arg0: i32, %arg1: i32) -> (i32, i32) {
    %c0_i32 = arith.constant 0 : i32
    %c0_i32_0 = arith.constant 0 : i32
    %c0_i32_1 = arith.constant 0 : i32
    return %c0_i32, %c0_i32_0 : i32, i32
  }
  func.func @transform_11(%arg0: i32, %arg1: i32) -> (i32, i32, i32) {
    %c0_i32 = arith.constant 0 : i32
    %c0_i32_0 = arith.constant 0 : i32
    return %arg1, %arg0, %c0_i32 : i32, i32, i32
  }
  func.func @transform_12(%arg0: i32, %arg1: i32) -> (i32, i32) {
    %c0_i32 = arith.constant 0 : i32
    %c0_i32_0 = arith.constant 0 : i32
    return %arg0, %c0_i32 : i32, i32
  }
}

</mosaic_0001>

<bundles_post_ra>
// kernel: rnn_forward.1
= control target key start
LH: loop header
LB: loop body
LE: loop exit
PB: predicated region body
PF: predicated region fallthrough
CT: control target
= control target key end

     0   :  { %s2006_s0 = inlined_call_operand.vmem [shape: bf16[8,4], index: 0, kind: input, shape index: {}]   ;;  %s2007_s1 = inlined_call_operand.vmem [shape: bf16[8,8,8], index: 1, kind: input, shape index: {}]   ;;  %s2008_s2 = inlined_call_operand.vmem [shape: f32[8,128], index: 2, kind: input, shape index: {}]   ;;  %s2009_s3 = inlined_call_operand.vmem [shape: u32[8,8,128], index: 3, kind: input, shape index: {}]   ;;  %s2010_s4 = inlined_call_operand.hbm [shape: bf16[4,256], index: 4, kind: input, shape index: {}]   ;;  %s2011_s5 = inlined_call_operand.vmem [shape: bf16[8,256], index: 5, kind: input, shape index: {}]   ;;  %s2012_s6 = inlined_call_operand.vmem [shape: bf16[128,256], index: 6, kind: input, shape index: {}]   ;;  %s2013_s7 = inlined_call_operand.hbm [shape: f32[1,256], index: 7, kind: input, shape index: {}]   ;;  %s2014_s8 = inlined_call_operand.vmem [shape: bf16[128,128], index: 8, kind: input, shape index: {}]   ;;  %s2015_s9 = inlined_call_operand.hbm [shape: bf16[128,128], index: 9, kind: input, shape index: {}]   ;;  %s2016_s10 = inlined_call_operand.hbm [shape: f32[1,128], index: 10, kind: input, shape index: {}]   ;;  %s2017_s11 = inlined_call_operand.vmem [shape: f32[8,8,128], index: 11, kind: output, shape index: {0}]   ;;  %s2018_s12 = inlined_call_operand.vmem [shape: f32[8,128], index: 12, kind: output, shape index: {1}]  }
   0x1   :  { %2024 = sst [smem:[#allocation15_spill]] %s2010_s4 }
   0x2   :  { %2025 = sst [smem:[#allocation16_spill]] %s2013_s7 }
   0x3   :  { %18 = vsyncpa [#allocation4], 0 }
   0x4   :  { %19 = vsyncpa [#allocation6], 0 }
   0x5   :  { %20 = vsyncpa [#allocation9], 0  ;;  %s1735_s21 = smov 0   ;;  %s1737_s22 = smov 0  }
   0x6   :  { %s1739_s23 = smov 0  }
   0x7 LB: > { %2026 = sst [smem:[#allocation13_spill]] %s1655_s22  ;;  %s1661_s24 = smov [#allocation5]   ;;  %s1659_s23 = sphi %s1739_s23, %s26_s23   ;;  %s1655_s22 = sphi %s1737_s22, %s2040_s22   ;;  %s1651_s21 = sphi %s1735_s21, %s2039_s21  }
   0x8   : > { %2027 = sst [smem:[#allocation14_spill]] %s1659_s23  ;;  %s396_s25 = sshll.u32 %s1661_s24, 4  ;;  %s397_s25 = int_to_ptr.vmem [resolvable:$true] %s396_s25 }
   0x9   : > { %s1277_s26 = sadd.s32 4294967295, %s1659_s23   ;;  %p1279_p0 = scmp.ge.s32.totalorder %s1659_s23, 1 }
   0xa   : > { %p352_p1 = scmp.lt.s32.totalorder %s1659_s23, 9  ;;  %p1753_p2 = scmp.eq.s32.totalorder %s1277_s26, 0 }
   0xb   : > { %s35_s29 = sadd.s32 1, %s1655_s22  ;;  %s1662_s14 = smov [#allocation3]  }
   0xc   : > { %s2028_s27 = scalar_select %p1753_p2, 1, 0 }
   0xd   : > { %p1757_p3 = pnand %p1279_p0, %p352_p1  ;;  %p1770_p6 = scmp.ge.s32.totalorder %s35_s29, 8 }
   0xe   : > { %s379_s15 = sshll.u32 %s1662_s14, 4  ;;  %s2032_s7 = sld [smem:[#allocation16_spill]]  ;;  %s1774_s15 = int_to_ptr.vmem [resolvable:$true] %s379_s15 }
   0xf   : > { %s2029_s28 = scalar_select %p1757_p3, 1, 0 }
  0x10   : > { %p1413_p4 = pneg %p1757_p3 }
  0x11   : > { %s2031_s13 = scalar_select %p1770_p6, 1, 0 }
  0x12   : > { %p1766_p5 = pnand %p1753_p2, %p1413_p4 }
  0x14   : > { %s1513_s18 = scalar_lea.hbm %s2032_s7, 32  ;;  %p1784_p8 = pneg %p1766_p5 }
  0x15   : > { %p1514_p7 = scmp.ne.s32.totalorder %s2032_s7, %s1513_s18  ;;  %p1520_p11 = scmp.lt.u32.totalorder %s1513_s18, %s2032_s7 }
  0x17   : > { %p1516_p9 = pnand %p1784_p8, %p1514_p7 }
  0x19   : > { %p1517_p10 = pneg %p1516_p9 }
  0x1b   : > { %p1522_p12 = pnand %p1520_p11, %p1517_p10 }
  0x1d   : > { %1525 = shalt.err (!%p1522_p12)
}
  0x1e   : > { %s1526_s16 = scalar_lea.vmem %s397_s25, 32  ;;  %p1534_p4 = scmp.lt.s32.totalorder %s397_s25, %s397_s25 }
  0x1f   : > { %p1527_p13 = scmp.ne.s32.totalorder %s397_s25, %s1526_s16  ;;  %p1535_p2 = scmp.lt.s32.totalorder %s1526_s16, %s1526_s16 }
  0x21   : > { %p1529_p0 = pnand %p1527_p13, %p1784_p8  ;;  %p1536_p3 = por %p1535_p2, %p1534_p4 }
  0x23   : > { %p1530_p1 = pneg %p1529_p0 }
  0x25   : > { %p1537_p6 = pnand %p1536_p3, %p1530_p1 }
  0x27   : > { %1540 = shalt.err (!%p1537_p6)
}
  0x28   : > { %1419 = dma.hbm_to_vmem [thread:$0]  (!%p1766_p5), %s2032_s7, 32, %s397_s25, [#allocation6]  }
  0x29   : > { %p2034_p7 = scmp.ne.s32.totalorder %s2031_s13, 0  ;;  %s2035_s4 = sld [smem:[#allocation15_spill]] }
  0x2b   : > { %s2042_s29 = smov (%p2034_p7, %s35_s29), 0 }
  0x2f   : > { %s1541_s26 = scalar_lea.hbm %s2035_s4, 64 }
  0x30   : > { %p1542_p2 = scmp.ne.s32.totalorder %s2035_s4, %s1541_s26  ;;  %p1548_p9 = scmp.lt.u32.totalorder %s1541_s26, %s2035_s4 }
  0x32   : > { %p1544_p3 = pnand %p1542_p2, %p1784_p8 }
  0x34   : > { %p1545_p6 = pneg %p1544_p3 }
  0x36   : > { %p1550_p10 = pnand %p1548_p9, %p1545_p6 }
  0x38   : > { %1553 = shalt.err (!%p1550_p10)
}
  0x39   : > { %s1554_s25 = scalar_lea.vmem %s1774_s15, 64  ;;  %p1562_p0 = scmp.lt.s32.totalorder %s1774_s15, %s1774_s15 }
  0x3a   : > { %p1555_p11 = scmp.ne.s32.totalorder %s1774_s15, %s1554_s25  ;;  %p1563_p1 = scmp.lt.s32.totalorder %s1554_s25, %s1554_s25 }
  0x3c   : > { %p1557_p12 = pnand %p1555_p11, %p1784_p8  ;;  %p1564_p4 = por %p1563_p1, %p1562_p0 }
  0x3e   : > { %p1558_p13 = pneg %p1557_p12 }
  0x40   : > { %p1565_p7 = pnand %p1564_p4, %p1558_p13 }
  0x42   : > { %1568 = shalt.err (!%p1565_p7)
}
  0x43   : > { %1416 = dma.hbm_to_vmem [thread:$0]  (!%p1766_p5), %s2035_s4, 64, %s1774_s15, [#allocation4]  }
  0x44   : > { %s1663_s13 = smov [#allocation7]   ;;  %s1569_s20 = scalar_lea.hbm %s2015_s9, 1024 }
  0x45   : > { %s409_s17 = sshll.u32 %s1663_s13, 4  ;;  %p1570_p2 = scmp.ne.s32.totalorder %s2015_s9, %s1569_s20  ;;  %s410_s17 = int_to_ptr.vmem [resolvable:$true] %s409_s17 }
  0x46   : > { %p1576_p9 = scmp.lt.u32.totalorder %s1569_s20, %s2015_s9 }
  0x47   : > { %p1572_p3 = pnand %p1570_p2, %p1784_p8 }
  0x49   : > { %p1573_p6 = pneg %p1572_p3 }
  0x4b   : > { %p1578_p10 = pnand %p1576_p9, %p1573_p6 }
  0x4d   : > { %1581 = shalt.err (!%p1578_p10)
}
  0x4e   : > { %s1582_s15 = scalar_lea.vmem %s410_s17, 1024  ;;  %p1590_p0 = scmp.lt.s32.totalorder %s410_s17, %s410_s17 }
  0x4f   : > { %p1583_p11 = scmp.ne.s32.totalorder %s410_s17, %s1582_s15  ;;  %p1591_p1 = scmp.lt.s32.totalorder %s1582_s15, %s1582_s15 }
  0x51   : > { %p1585_p12 = pnand %p1583_p11, %p1784_p8  ;;  %p1592_p4 = por %p1591_p1, %p1590_p0 }
  0x53   : > { %p1586_p13 = pneg %p1585_p12 }
  0x55   : > { %p1593_p7 = pnand %p1592_p4, %p1586_p13 }
  0x57   : > { %1596 = shalt.err (!%p1593_p7)
}
  0x58   : > { %s1664_s22 = smov 64   ;;  %s1665_s23 = smov 4  }
  0x59   : > { %1422 = dma.hbm_to_vmem [thread:$0]  (!%p1766_p5), %s2015_s9, 1024, %s410_s17, [#allocation6], %s1664_s22, %s1664_s22, %s1665_s23  }
  0x5a   : > { %s1666_s18 = smov [#allocation8]   ;;  %s1597_s16 = scalar_lea.hbm %s2016_s10, 16 }
  0x5b   : > { %s423_s20 = sshll.u32 %s1666_s18, 4  ;;  %p1598_p2 = scmp.ne.s32.totalorder %s2016_s10, %s1597_s16  ;;  %s424_s20 = int_to_ptr.vmem [resolvable:$true] %s423_s20 }
  0x5c   : > { %p1604_p9 = scmp.lt.u32.totalorder %s1597_s16, %s2016_s10 }
  0x5d   : > { %p1600_p3 = pnand %p1598_p2, %p1784_p8 }
  0x5f   : > { %p1601_p6 = pneg %p1600_p3 }
  0x61   : > { %p1606_p10 = pnand %p1604_p9, %p1601_p6 }
  0x63   : > { %1609 = shalt.err (!%p1606_p10)
}
  0x64   : > { %s1610_s17 = scalar_lea.vmem %s424_s20, 16  ;;  %s1617_s22 = scalar_lea.vmem %s424_s20, 32 }
  0x65   : > { %p1611_p11 = scmp.ne.s32.totalorder %s424_s20, %s1610_s17  ;;  %p1618_p0 = scmp.lt.s32.totalorder %s424_s20, %s424_s20 }
  0x66   : > { %p1619_p1 = scmp.lt.s32.totalorder %s1617_s22, %s1610_s17 }
  0x67   : > { %p1613_p12 = pnand %p1611_p11, %p1784_p8 }
  0x68   : > { %p1620_p4 = por %p1619_p1, %p1618_p0 }
  0x69   : > { %p1614_p13 = pneg %p1613_p12 }
  0x6b   : > { %p1621_p7 = pnand %p1620_p4, %p1614_p13 }
  0x6d   : > { %1624 = shalt.err (!%p1621_p7)
}
  0x6e   : > { %1425 = dma.hbm_to_vmem [thread:$0]  (!%p1766_p5), %s2016_s10, 16, %s424_s20, [#allocation9]  }
  0x6f   : > { %p2036_p2 = scmp.ne.s32.totalorder %s2029_s28, 0 }
  0x70   : > { %p2037_p3 = scmp.ne.s32.totalorder (!%p2036_p2), %s2028_s27, 0 }
  0x71   : > { %456 = sbr.rel (%p2036_p2) target bundleno = 922 (0x39a), region = 64 }
  0x78   : > { %1638 = dma.done.wait (%p2037_p3), [#allocation4], 64  }
  0x79   : > { %1640 = vsyncadd (%p2037_p3), [#allocation4], 4294967232 }
  0x7a   : > { %1642 = dma.done.wait (%p2037_p3), [#allocation6], 1056  }
  0x7b   : > { %1644 = vsyncadd (%p2037_p3), [#allocation6], 4294966240 }
  0x7c   : > { %1646 = dma.done.wait (%p2037_p3), [#allocation9], 16  }
  0x7d   : > { %1648 = vsyncadd (%p2037_p3), [#allocation9], 4294967280  ;;  %p537_p5 = scmp.lt.s32.totalorder %s1651_s21, 7  ;;  %p1295_p8 = scmp.ne.s32.totalorder %s1651_s21, 0 }
  0x7e   : > { %v571_v0 = vld [vmem:[%s2008_s2] sm:$0xff] (!%p1295_p8) }
  0x7f   : > { %s538_s4 = scalar_select %p537_p5, %s1651_s21, 7 }
  0x80   : > { %570 = sbr.rel (%p1295_p8) target bundleno = 135 (0x87), region = 84  ;;  %572 = vst [vmem:[#allocation2] sm:$0xff] (!%p1295_p8), %v571_v0 }
  0x81   : > { %s1292_s7 = sshll.u32 %s538_s4, 2  ;;  %s1293_s28 = sshll.u32 %s538_s4, 3 }
  0x82   : > { %s543_s19 = scalar_lea.vmem %s2007_s1, %s1292_s7  ;;  %s1885_s26 = scalar_lea.vmem %s2009_s3, %s1293_s28 }
  0x83   : > { %s1890_s27 = scalar_lea.vmem %s2017_s11, %s1293_s28 }
  0x87 PF: > { %v1467_v1 = vld [vmem:[%s2012_s6 + $0x4] ss:$8 sps:$4 sm:$0xff]   ;;  %v1469_v2 = vld [vmem:[%s2012_s6] ss:$8 sps:$4 sm:$0xff]   ;;  %v1667_v3 = vmov 0   ;;  %vm588_vm0 = vcmask 1043456   ;;  %v838_v56 = vlaneseq }
  0x88   : > { %627 = vmatprep.mubr.bf16.mxu1 %v1667_v3  ;;  %825 = vmatprep.mubr.bf16.mxu0 %v1667_v3  ;;  %v1470_v4 = vld [vmem:[%s2012_s6 + $0x14] ss:$8 sps:$4 sm:$0xff]   ;;  %v1472_v5 = vld [vmem:[%s2012_s6 + $0x10] ss:$8 sps:$4 sm:$0xff]   ;;  %v578_v6 = vld [vmem:[%s2011_s5] sm:$0xff]  ;;  %vm649_vm1 = vcmask 1041408  }
  0x89   : > { %793 = vmatprep.subr.bf16.mxu0 %v1467_v1  ;;  %v1473_v7 = vld [vmem:[%s2012_s6 + $0x24] ss:$8 sps:$4 sm:$0xff]   ;;  %v1297_v8 = vcombine.high %v578_v6, %v578_v6  ;;  %v1296_v9 = vcombine.low %v578_v6, %v578_v6  ;;  %v1476_v10 = vld [vmem:[%s2012_s6 + $0x20] ss:$8 sps:$4 sm:$0xff]   ;;  %vm584_vm2 = vcmask 64512   ;;  %v1668_v20 = vmov 0.0  }
  0x8a   : > { %794 = vmatpush1.bf16.msra.mxu0 %v1469_v2  ;;  %v576_v12 = vld [vmem:[%s543_s19] sm:$0xf]  ;;  %v1300_v13 = vld.sshfl [vmem:[#allocation3] sm:$0x33 pattern:$0x76325410] }
  0x8b   : > { %795 = vmatprep.subr.bf16.mxu0 %v1470_v4  ;;  %1298 = vmatprep.subr.msk.bf16.mxu1 %vm588_vm0, %v1297_v8  ;;  %v590_v11 = vsel %vm588_vm0, %v1296_v9, 0  ;;  %v1478_v14 = vld [vmem:[%s2012_s6 + $0x34] ss:$8 sps:$4 sm:$0xff]   ;;  %v644_v15 = vcombine.high %v1300_v13, %v1300_v13  ;;  %v651_v16 = vsel %vm649_vm1, %v1300_v13, 0  ;;  %v1480_v17 = vld [vmem:[%s2012_s6 + $0x30] ss:$8 sps:$4 sm:$0xff]  }
  0x8c   : > { %596 = vmatpush1.bf16.msra.mxu1 %v590_v11  ;;  %v1481_v18 = vld [vmem:[%s2012_s6 + $0x44] ss:$8 sps:$4 sm:$0xff]   ;;  %v1483_v19 = vld [vmem:[%s2012_s6 + $0x40] ss:$8 sps:$4 sm:$0xff]   ;;  %vm645_vm3 = vcmask 31744   ;;  %v573_v31 = vld [vmem:[#allocation2] sm:$0xff] }
  0x8d   : > { %1301 = vmatprep.subr.msk.bf16.mxu1 %vm649_vm1, %v644_v15  ;;  %v575_v21 = vld [vmem:[%s2006_s0] sm:$0xf]  ;;  %v1484_v23 = vld [vmem:[%s2012_s6 + $0x54] ss:$8 sps:$4 sm:$0xff]   ;;  %v1486_v24 = vld [vmem:[%s2012_s6 + $0x50] ss:$8 sps:$4 sm:$0xff]   ;;  %v574_v32 = vpack.c.bf16 %v573_v31, %v573_v31 }
  0x8e   : > { %796 = vmatpush1.bf16.msra.mxu0 %v1472_v5  ;;  %v1493_v22 = vld [vmem:[#allocation7] sm:$0xff]   ;;  %v1495_v26 = vld [vmem:[#allocation7 + $0x8] sm:$0xff]   ;;  %v1497_v28 = vld [vmem:[#allocation7 + $0x10] sm:$0xff]   ;;  %vm1669_vm4 = vmmov 0   ;;  %v839_v57 = vshrl.u32 %v838_v56, 7 }
  0x8f   : > { %797 = vmatprep.subr.bf16.mxu0 %v1473_v7  ;;  %1299 = vmatmul.mubr.msk.bf16.vlgmr.msra.gmra.mrb[0].mxu1 %vm584_vm2, %v576_v12  ;;  %v1487_v25 = vld [vmem:[%s2012_s6 + $0x64] ss:$8 sps:$4 sm:$0xff]   ;;  %v1489_v27 = vld [vmem:[%s2012_s6 + $0x60] ss:$8 sps:$4 sm:$0xff]   ;;  %v1490_v29 = vld [vmem:[%s2012_s6 + $0x74] ss:$8 sps:$4 sm:$0xff]  }
  0x90   : > { %657 = vmatpush1.bf16.msra.mxu1 %v651_v16  ;;  %688 = vmatprep.mubr.bf16.mxu1 %v1667_v3  ;;  %v1492_v30 = vld [vmem:[%s2012_s6 + $0x70] ss:$8 sps:$4 sm:$0xff]   ;;  %v1494_v33 = vld [vmem:[%s2014_s8] sm:$0xff]   ;;  %v1496_v34 = vld [vmem:[%s2014_s8 + $0x8] sm:$0xff]   ;;  %v840_v58 = vsub.s32 0, %v839_v57  ;;  %v844_v60 = vsub.s32 1, %v839_v57 }
  0x91   : > { %1357 = vmatprep.subr.bf16.mxu1 %v1668_v20  ;;  %v1498_v35 = vld [vmem:[%s2014_s8 + $0x10] sm:$0xff]   ;;  %v1500_v37 = vld [vmem:[%s2014_s8 + $0x18] sm:$0xff]   ;;  %v1502_v39 = vld [vmem:[%s2014_s8 + $0x20] sm:$0xff]  }
  0x92   : > { %798 = vmatpush1.bf16.msra.mxu0 %v1476_v10  ;;  %v1499_v36 = vld [vmem:[#allocation7 + $0x18] sm:$0xff]   ;;  %v1501_v38 = vld [vmem:[#allocation7 + $0x20] sm:$0xff]   ;;  %v1503_v40 = vld [vmem:[#allocation7 + $0x28] sm:$0xff]  }
  0x93   : > { %799 = vmatprep.subr.bf16.mxu0 %v1478_v14  ;;  %v1504_v41 = vld [vmem:[%s2014_s8 + $0x28] sm:$0xff]   ;;  %v1506_v43 = vld [vmem:[%s2014_s8 + $0x30] sm:$0xff]   ;;  %v1508_v45 = vld [vmem:[%s2014_s8 + $0x38] sm:$0xff]  }
  0x94   : > { %v1505_v42 = vld [vmem:[#allocation7 + $0x30] sm:$0xff]   ;;  %v1507_v44 = vld [vmem:[#allocation7 + $0x38] sm:$0xff]   ;;  %v1335_v13 = vld [vmem:[#allocation8] ss:$0 sm:$0xff] }
  0x95   : > { %v836_v59 = vld [vmem:[#allocation5] sm:$0x3]  ;;  %v1069_v16 = vld [vmem:[%s1885_s26] sm:$0xff] }
  0x96   : > { %800 = vmatpush1.bf16.msra.mxu0 %v1480_v17  ;;  %v841_v61 = vrot.slane %v836_v59, %v840_v58  ;;  %v845_v63 = vrot.slane %v836_v59, %v844_v60  ;;  %v1074_v17 = vand.u32 127, %v838_v56  ;;  %vm1070_vm5 = vcmp.ge.u32.totalorder %v1069_v16, 429496730 }
  0x97   : > { %801 = vmatprep.subr.bf16.mxu0 %v1481_v18  ;;  %1302 = vmatmul.mubr.msk.bf16.vlgmr.msra.gmra.mrb[4].mxu1 %vm645_vm3, %v575_v21 }
  0x98   : > { %1358 = vmatpush3.bf16.msra.mxu1 %v1493_v22  ;;  %1373 = vmatprep.mubr.msk.bf16.mxu1 %vm1669_vm4, %v1668_v20  ;;  %vm1075_vm6 = vcmp.lt.s32.totalorder %v1074_v17, 16 }
  0x99   : > { %1359 = vmatprep.subr.bf16.mxu1 %v1668_v20 }
  0x9a   : > { %802 = vmatpush1.bf16.msra.mxu0 %v1483_v19 }
  0x9b   : > { %803 = vmatprep.subr.bf16.mxu0 %v1484_v23 }
  0x9c   : > { %1360 = vmatpush3.bf16.msra.mxu1 %v1495_v26 }
  0x9d   : > { %1361 = vmatprep.subr.bf16.mxu1 %v1668_v20 }
  0x9e   : > { %804 = vmatpush1.bf16.msra.mxu0 %v1486_v24 }
  0x9f   : > { %805 = vmatprep.subr.bf16.mxu0 %v1487_v25 }
  0xa0   : > { %1362 = vmatpush3.bf16.msra.mxu1 %v1497_v28 }
  0xa1   : > { %1363 = vmatprep.subr.bf16.mxu1 %v1668_v20 }
  0xa2   : > { %806 = vmatpush1.bf16.msra.mxu0 %v1489_v27 }
  0xa3   : > { %807 = vmatprep.subr.bf16.mxu0 %v1490_v29 }
  0xa4   : > { %1364 = vmatpush3.bf16.msra.mxu1 %v1499_v36 }
  0xa5   : > { %1365 = vmatprep.subr.bf16.mxu1 %v1668_v20 }
  0xa6   : > { %808 = vmatpush1.bf16.msra.mxu0 %v1492_v30 }
  0xa7   : > { %1377 = vmatprep.subr.bf16.mxu0 %v1668_v20 }
  0xa8   : > { %1366 = vmatpush3.bf16.msra.mxu1 %v1501_v38 }
  0xa9   : > { %826 = vmatmul.mubr.bf16.vlgmr.msra.gmra.mrb[0].mxu0 %v574_v32  ;;  %1367 = vmatprep.subr.bf16.mxu1 %v1668_v20 }
  0xaa   : > { %1378 = vmatpush3.bf16.msra.mxu0 %v1494_v33  ;;  %1393 = vmatprep.mubr.msk.bf16.mxu0 %vm1669_vm4, %v1668_v20 }
  0xab   : > { %1379 = vmatprep.subr.bf16.mxu0 %v1668_v20 }
  0xac   : > { %1368 = vmatpush3.bf16.msra.mxu1 %v1503_v40 }
  0xad   : > { %1369 = vmatprep.subr.bf16.mxu1 %v1668_v20 }
  0xae   : > { %1380 = vmatpush3.bf16.msra.mxu0 %v1496_v34 }
  0xaf   : > { %1381 = vmatprep.subr.bf16.mxu0 %v1668_v20 }
  0xb0   : > { %1370 = vmatpush3.bf16.msra.mxu1 %v1505_v42 }
  0xb1   : > { %1371 = vmatprep.subr.bf16.mxu1 %v1668_v20 }
  0xb2   : > { %1382 = vmatpush3.bf16.msra.mxu0 %v1498_v35 }
  0xb3   : > { %1383 = vmatprep.subr.bf16.mxu0 %v1668_v20 }
  0xb4   : > { %1372 = vmatpush3.bf16.msra.mxu1 %v1507_v44 }
  0xb6   : > { %1384 = vmatpush3.bf16.msra.mxu0 %v1500_v37 }
  0xb7   : > { %1385 = vmatprep.subr.bf16.mxu0 %v1668_v20  ;;  %1374 = vmatmul.mubr.bf16.vlgmr.msra.gmra.mrb[8].mxu1 %v574_v32 }
  0xba   : > { %1386 = vmatpush3.bf16.msra.mxu0 %v1502_v39 }
  0xbb   : > { %1387 = vmatprep.subr.bf16.mxu0 %v1668_v20 }
  0xbe   : > { %1388 = vmatpush3.bf16.msra.mxu0 %v1504_v41 }
  0xbf   : > { %1389 = vmatprep.subr.bf16.mxu0 %v1668_v20 }
  0xc2   : > { %1390 = vmatpush3.bf16.msra.mxu0 %v1506_v43 }
  0xc3   : > { %1391 = vmatprep.subr.bf16.mxu0 %v1668_v20 }
  0xc6   : > { %1392 = vmatpush3.bf16.msra.mxu0 %v1508_v45 }
 0x162   : > { %v629_v46 = vpop.f32.mrb[0].mxu1 }
 0x163   : > { %v631_v47 = vpop.f32.mrb[1].mxu1 }
 0x164   : > { %v633_v48 = vpop.f32.mrb[2].mxu1 }
 0x165   : > { %v634_v49 = vpop.f32.mrb[3].mxu1 }
 0x16a   : > { %v690_v50 = vpop.f32.mrb[4].mxu1 }
 0x16b   : > { %v691_v51 = vadd.f32 %v690_v50, %v629_v46  ;;  %v692_v52 = vpop.f32.mrb[5].mxu1 }
 0x16c   : > { %v693_v53 = vadd.f32 %v692_v52, %v631_v47  ;;  %v694_v54 = vpop.f32.mrb[6].mxu1 }
 0x16d   : > { %v695_v55 = vpop.f32.mrb[7].mxu1 }
 0x17c   : > { %v827_v62 = vpop.f32.mrb[0].mxu0 }
 0x17d   : > { %v834_v0 = vadd.f32 %v827_v62, %v691_v51  ;;  %v829_v1 = vpop.f32.mrb[1].mxu0 }
 0x17e   : > { %v835_v2 = vadd.f32 %v829_v1, %v693_v53  ;;  %v831_v3 = vpop.f32.mrb[2].mxu0 }
 0x17f   : > { %v848_v4 = vadd.f32 %v841_v61, %v834_v0  ;;  %v832_v5 = vpop.f32.mrb[3].mxu0 }
 0x180   : > { %v849_v6 = vadd.f32 %v845_v63, %v835_v2 }
 0x181   : > { %v852_v7 = vpack.c.bf16 %v848_v4, %v848_v4 }
 0x182   : > { %850 = vst [vmem:[#allocation2] sm:$0xff] %v849_v6  ;;  %851 = vst [vmem:[%s2018_s12] sm:$0xff] %v849_v6 }
 0x183   : > { %1394 = vmatmul.mubr.bf16.vlgmr.msra.gmra.mrb[4].mxu0 %v852_v7 }
 0x18a   : > { %v967_v8 = vpop.f32.mrb[8].mxu1 }
 0x18b   : > { %v1375_v9 = vpop.f32.mrb[9].mxu1 }
 0x18c   : > { %v970_v10 = vpop.f32.mrb[10].mxu1 }
 0x18d   : > { %v1376_v11 = vpop.f32.mrb[11].mxu1 }
 0x256   : > { %v1055_v12 = vpop.f32.mrb[4].mxu0 }
 0x257   : > { %v1056_v14 = vadd.f32 %v1055_v12, %v967_v8  ;;  %v1395_v15 = vpop.f32.mrb[5].mxu0 }
 0x258   : > { %v1058_v18 = vpop.f32.mrb[6].mxu0 }
 0x259   : > { %v1068_v19 = vadd.f32 %v1335_v13, %v1056_v14  ;;  %v1396_v20 = vpop.f32.mrb[7].mxu0 }
 0x25b   : > { %v1071_v21 = vmul.f32 1.1111112, %v1068_v19 }
 0x25d   : > { %v1072_v22 = vsel %vm1070_vm5, %v1071_v21, 0.0 }
 0x25e   : > { %v1076_v23 = vsel %vm1075_vm6, %v1072_v22, -1e+30 }
 0x25f   : > { %1077 = vmax.xlane.f32.xlu0 %v1076_v23 }
 0x2ec   : > { %v1078_v24 = vpop.xlane.xlu0 %1077 }
 0x2ed   : > { %v1079_v25 = vsub.f32 %v1076_v23, %v1078_v24 }
 0x2ef   : > { %v1080_v26 = vmul.f32 1.442695, %v1079_v25 }
 0x2f1   : > { %1509 = vpow2.f32 %v1080_v26 }
 0x2fb   : > { %v1510_v27 = vpop.eup %1509 }
 0x2fc   : > { %1082 = vadd.xlane.f32.xlu0 %v1510_v27 }
 0x389   : > { %v1083_v28 = vpop.xlane.xlu0 %1082 }
 0x38a   : > { %1511 = vlog2.f32 %v1083_v28 }
 0x394   : > { %v1512_v29 = vpop.eup %1511 }
 0x395   : > { %v1085_v30 = vmul.f32 0.6931472, %v1512_v29 }
 0x397   : > { %v1086_v31 = vsub.f32 %v1079_v25, %v1085_v30 }
 0x399   : > { %1087 = vst [vmem:[%s1890_s27] sm:$0xff] %v1086_v31 }
 0x39a PF: > { %s2038_s26 = sld [smem:[#allocation14_spill]]  ;;  %s2039_s21 = sld [smem:[#allocation13_spill]] }
 0x39b   : > { %s2040_s22 = smov %s2042_s29 }
 0x3a0   : > { %s26_s23 = sadd.s32 1, %s2038_s26  }
 0x3a1   : > { %p23_p6 = scmp.ge.s32.totalorder %s26_s23, 10  }
 0x3a3   :  { %25 = sbr.rel (!%p23_p6) target bundleno = 7 (0x7), region = 136 }
 0x3aa   :  { %1127 = vsyncpa [#allocation4], 1 }
 0x3ab   :  { %1129 = vsyncpa [#allocation4 + $0x1], 1 }
 0x3ac   :  { %1130 = vsyncpa [#allocation6], 1 }
 0x3ad   :  { %1131 = vsyncpa [#allocation9], 1 }

</bundles_post_ra>
